<compile_context>
chip_gen: v5e
topology: v5e:2x2
jax: 0.10.0
libtpu: 0.0.40
codegen_flags: <defaults>
</compile_context>

<pallas_src>
import jax
import jax.numpy as jnp
from jax.experimental import pallas as pl
from jax.experimental.pallas import tpu as pltpu


def mlp_kernel(x_ref, w1_ref, b1_ref, w2_ref, b2_ref, o_ref):
    # hidden = relu(x @ W1 + b1), f32 MXU accumulation, bias+ReLU in f32.
    h = jnp.dot(x_ref[...], w1_ref[...], preferred_element_type=jnp.float32)
    h = jnp.maximum(h + b1_ref[...], 0.0)
    # output = hidden @ W2 + b2
    out = jnp.dot(h.astype(w2_ref.dtype), w2_ref[...],
                  preferred_element_type=jnp.float32)
    o_ref[...] = (out + b2_ref[...]).astype(o_ref.dtype)


def _round_up(x, m):
    return (x + m - 1) // m * m


def prepare_params(w1, b1, w2, b2):
    """Pad parameters ONCE, outside the per-call hot path.

    Only the hidden/contraction dim is padded (to a multiple of 128 lanes);
    the input-feature and output dims stay unpadded so the activation and
    output HBM streams carry no padding.  Zero padding keeps the math exact.
    Accepts 1-D or 2-D biases (PyTorch convention is 1-D).
    """
    nf, nu = w1.shape
    no = w2.shape[1]
    u_pad = _round_up(nu, 128)

    b1 = jnp.reshape(b1, (1, nu))
    b2 = jnp.reshape(b2, (1, no))

    w1p = jnp.pad(w1, ((0, 0), (0, u_pad - nu)))
    b1p = jnp.pad(b1, ((0, 0), (0, u_pad - nu)))
    w2p = jnp.pad(w2, ((0, u_pad - nu), (0, 0)))
    return w1p, b1p, w2p, b2


def _choose_batch_tile(B, batch_tile):
    """Pick the batch tile: a multiple of 8 sublanes, capped at batch_tile,
    with >=2 grid steps whenever B allows it (feeds both v7x TensorCores) and
    minimal tail padding."""
    batch_tile = max(8, _round_up(batch_tile, 8))
    b8 = _round_up(B, 8)
    if b8 <= 8:
        return 8
    steps = max(2, pl.cdiv(b8, batch_tile))
    return _round_up(pl.cdiv(b8, steps), 8)


def net_forward(x, w1p, b1p, w2p, b2p, *, batch_tile=1024):
    """x: [B, n_features]; padded params from `prepare_params`.
    Returns [B, n_output]."""
    B, nf = x.shape
    u_pad = w1p.shape[1]
    no = w2p.shape[1]
    dtype = x.dtype
    itemsize = jnp.dtype(dtype).itemsize

    tb = _choose_batch_tile(B, batch_tile)
    b_pad = _round_up(B, tb)
    if b_pad != B:
        # Only the batch (row) dim is ever padded, and only up to one tile.
        x = jnp.pad(x, ((0, b_pad - B), (0, 0)))

    grid = (b_pad // tb,)

    # Cost estimate with the actual (post-fix) sizes.
    cost = pl.CostEstimate(
        flops=2 * b_pad * (nf * u_pad + u_pad * no),
        transcendentals=0,
        bytes_accessed=(b_pad * nf + w1p.size + b1p.size + w2p.size + b2p.size
                        + b_pad * no) * itemsize,
    )

    # VMEM working set: double-buffered x/out tiles, single-buffered weights,
    # plus the f32 hidden intermediate.  Explicit limit keeps large batch
    # tiles compiling on v5e's 16 MiB default scoped VMEM (capped at 32 MiB,
    # within every generation's scoped budget).
    vmem_needed = (
        itemsize * (2 * tb * nf + 2 * tb * no
                    + w1p.size + b1p.size + w2p.size + b2p.size)
        + 4 * tb * u_pad
    )
    vmem_limit = int(min(32 << 20, max(8 << 20, 2 * vmem_needed)))

    resident = lambda i: (0, 0)   # weights/biases: same block every step
    out = pl.pallas_call(
        mlp_kernel,
        out_shape=jax.ShapeDtypeStruct((b_pad, no), dtype),
        grid=grid,
        in_specs=[
            # Streamed activations: feature dim unpadded (== full array dim).
            pl.BlockSpec((tb, nf), lambda i: (i, 0)),
            # Resident, single-buffered weights/biases (block index is constant).
            pl.BlockSpec((nf, u_pad), resident, pipeline_mode=pl.Buffered(1)),
            pl.BlockSpec((1, u_pad), resident, pipeline_mode=pl.Buffered(1)),
            pl.BlockSpec((u_pad, no), resident, pipeline_mode=pl.Buffered(1)),
            pl.BlockSpec((1, no), resident, pipeline_mode=pl.Buffered(1)),
        ],
        # Output stays unpadded in the lane dim: 16x less writeback than o_pad=128
        # and no wrapper column-slice pass.
        out_specs=pl.BlockSpec((tb, no), lambda i: (i, 0)),
        compiler_params=pltpu.CompilerParams(
            dimension_semantics=("parallel",),
            vmem_limit_bytes=vmem_limit,
        ),
        cost_estimate=cost,
    )(x, w1p, b1p, w2p, b2p)

    return out[:B] if b_pad != B else out


def init_params(key, n_features, n_units, n_output, dtype=jnp.float32):
    """Deterministic init mimicking torch.nn.Linear default (U(-1/sqrt(fan_in), +))."""
    k1, k2, k3, k4 = jax.random.split(key, 4)
    bound1 = 1.0 / jnp.sqrt(n_features)
    bound2 = 1.0 / jnp.sqrt(n_units)
    # Stored as [in, out] (i.e. PyTorch weight.T) so the kernel uses x @ W.
    w1 = jax.random.uniform(k1, (n_features, n_units), dtype, -bound1, bound1)
    b1 = jax.random.uniform(k2, (n_units,), dtype, -bound1, bound1)
    w2 = jax.random.uniform(k3, (n_units, n_output), dtype, -bound2, bound2)
    b2 = jax.random.uniform(k4, (n_output,), dtype, -bound2, bound2)
    return w1, b1, w2, b2


if __name__ == "__main__":
    key = jax.random.PRNGKey(0)
    n_features, n_units, n_output = 16, 32, 8
    batch = 10   # non-multiple-of-8: exercises tail padding + 2-step grid

    kx, kp = jax.random.split(key)
    x = jax.random.normal(kx, (batch, n_features), jnp.float32)
    w1, b1, w2, b2 = init_params(kp, n_features, n_units, n_output)

    # Pad weights once (outside the hot path), then run the fused kernel.
    w1p, b1p, w2p, b2p = prepare_params(w1, b1, w2, b2)
    out = net_forward(x, w1p, b1p, w2p, b2p)
    jax.block_until_ready(out)

    # Reference check in plain JAX (same math as the PyTorch forward).
    ref = jnp.maximum(x @ w1 + b1, 0.0) @ w2 + b2
    assert out.shape == (batch, n_output)
    assert jnp.allclose(out, ref, atol=1e-5, rtol=1e-5)

    print("KERNEL_OK")
</pallas_src>

<mosaic_0001>
module attributes {stable_mosaic.version = 11 : i64} {
  func.func @mlp_kernel(%arg0: i32, %arg1: memref<8x16xf32, #tpu.memory_space<vmem>>, %arg2: memref<16x128xf32, #tpu.memory_space<vmem>>, %arg3: memref<1x128xf32, #tpu.memory_space<vmem>>, %arg4: memref<128x8xf32, #tpu.memory_space<vmem>>, %arg5: memref<1x8xf32, #tpu.memory_space<vmem>>, %arg6: memref<8x8xf32, #tpu.memory_space<vmem>>) attributes {dimension_semantics = [#tpu.dimension_semantics<parallel>], iteration_bounds = array<i64: 2>, scalar_prefetch = 0 : i64, scratch_operands = 0 : i64, tpu.core_type = #tpu.core_type<tc>, window_params = [{transform_indices = @transform_0, window_bounds = array<i64: 8, 16>}, {pipeline_mode = #tpu.pipeline_mode<synchronous>, transform_indices = @transform_1, window_bounds = array<i64: 16, 128>}, {pipeline_mode = #tpu.pipeline_mode<synchronous>, transform_indices = @transform_2, window_bounds = array<i64: 1, 128>}, {pipeline_mode = #tpu.pipeline_mode<synchronous>, transform_indices = @transform_3, window_bounds = array<i64: 128, 8>}, {pipeline_mode = #tpu.pipeline_mode<synchronous>, transform_indices = @transform_4, window_bounds = array<i64: 1, 8>}, {transform_indices = @transform_5, window_bounds = array<i64: 8, 8>}]} {
    %c0 = arith.constant 0 : index
    %c0_0 = arith.constant 0 : index
    %0 = vector.load %arg1[%c0, %c0_0] : memref<8x16xf32, #tpu.memory_space<vmem>>, vector<8x16xf32>
    %c0_1 = arith.constant 0 : index
    %c0_2 = arith.constant 0 : index
    %1 = vector.load %arg2[%c0_1, %c0_2] : memref<16x128xf32, #tpu.memory_space<vmem>>, vector<16x128xf32>
    %cst = arith.constant dense<0.000000e+00> : vector<8x128xf32>
    %2 = tpu.matmul %0, %1, %cst {dimension_numbers = #tpu.dot_dimension_numbers<[1], [0], [0], [1], [0, 0, 1, 1], [], []>} : vector<8x16xf32>, vector<16x128xf32>, vector<8x128xf32> -> vector<8x128xf32>
    %c0_3 = arith.constant 0 : index
    %c0_4 = arith.constant 0 : index
    %3 = vector.load %arg3[%c0_3, %c0_4] : memref<1x128xf32, #tpu.memory_space<vmem>>, vector<1x128xf32>
    %4 = vector.broadcast %3 : vector<1x128xf32> to vector<8x128xf32>
    %5 = arith.addf %2, %4 : vector<8x128xf32>
    %cst_5 = arith.constant 0.000000e+00 : f32
    %6 = vector.broadcast %cst_5 : f32 to vector<8x128xf32>
    %7 = arith.maximumf %5, %6 : vector<8x128xf32>
    %c0_6 = arith.constant 0 : index
    %c0_7 = arith.constant 0 : index
    %8 = vector.load %arg4[%c0_6, %c0_7] : memref<128x8xf32, #tpu.memory_space<vmem>>, vector<128x8xf32>
    %cst_8 = arith.constant dense<0.000000e+00> : vector<8x8xf32>
    %9 = tpu.matmul %7, %8, %cst_8 {dimension_numbers = #tpu.dot_dimension_numbers<[1], [0], [0], [1], [0, 0, 1, 1], [], []>} : vector<8x128xf32>, vector<128x8xf32>, vector<8x8xf32> -> vector<8x8xf32>
    %c0_9 = arith.constant 0 : index
    %c0_10 = arith.constant 0 : index
    %10 = vector.load %arg5[%c0_9, %c0_10] : memref<1x8xf32, #tpu.memory_space<vmem>>, vector<1x8xf32>
    %11 = vector.broadcast %10 : vector<1x8xf32> to vector<8x8xf32>
    %12 = arith.addf %9, %11 : vector<8x8xf32>
    %c0_11 = arith.constant 0 : index
    %c0_12 = arith.constant 0 : index
    %13 = vector.load %arg6[%c0_11, %c0_12] : memref<8x8xf32, #tpu.memory_space<vmem>>, vector<8x8xf32>
    tpu.vector_store %arg6[%c0_11, %c0_12], %12 {strides = array<i32>} : memref<8x8xf32, #tpu.memory_space<vmem>>, vector<8x8xf32>,
    return
  }
  func.func @transform_0(%arg0: i32) -> (i32, i32) {
    %c0_i32 = arith.constant 0 : i32
    %c0_i32_0 = arith.constant 0 : i32
    return %arg0, %c0_i32 : i32, i32
  }
  func.func @transform_1(%arg0: i32) -> (i32, i32) {
    %c0_i32 = arith.constant 0 : i32
    %c0_i32_0 = arith.constant 0 : i32
    %c0_i32_1 = arith.constant 0 : i32
    return %c0_i32, %c0_i32_0 : i32, i32
  }
  func.func @transform_2(%arg0: i32) -> (i32, i32) {
    %c0_i32 = arith.constant 0 : i32
    %c0_i32_0 = arith.constant 0 : i32
    %c0_i32_1 = arith.constant 0 : i32
    return %c0_i32, %c0_i32_0 : i32, i32
  }
  func.func @transform_3(%arg0: i32) -> (i32, i32) {
    %c0_i32 = arith.constant 0 : i32
    %c0_i32_0 = arith.constant 0 : i32
    %c0_i32_1 = arith.constant 0 : i32
    return %c0_i32, %c0_i32_0 : i32, i32
  }
  func.func @transform_4(%arg0: i32) -> (i32, i32) {
    %c0_i32 = arith.constant 0 : i32
    %c0_i32_0 = arith.constant 0 : i32
    %c0_i32_1 = arith.constant 0 : i32
    return %c0_i32, %c0_i32_0 : i32, i32
  }
  func.func @transform_5(%arg0: i32) -> (i32, i32) {
    %c0_i32 = arith.constant 0 : i32
    %c0_i32_0 = arith.constant 0 : i32
    return %arg0, %c0_i32 : i32, i32
  }
}

</mosaic_0001>

<bundles_post_ra>
// kernel: tpu_custom_call.1
= control target key start
LH: loop header
LB: loop body
LE: loop exit
PB: predicated region body
PF: predicated region fallthrough
CT: control target
= control target key end

     0   :  { %s405_s18 = smov 0   ;;  %s489_s0 = inlined_call_operand.vmem [shape: f32[16,16], index: 0, kind: input, shape index: {}]   ;;  %s490_s1 = inlined_call_operand.vmem [shape: f32[16,128], index: 1, kind: input, shape index: {}]   ;;  %s491_s2 = inlined_call_operand.vmem [shape: f32[1,128], index: 2, kind: input, shape index: {}]   ;;  %s492_s3 = inlined_call_operand.vmem [shape: f32[128,8], index: 3, kind: input, shape index: {}]   ;;  %s493_s4 = inlined_call_operand.vmem [shape: f32[1,8], index: 4, kind: input, shape index: {}]   ;;  %s494_s5 = inlined_call_operand.vmem [shape: f32[16,8], index: 5, kind: output, shape index: {}]  }
   0x1 LB: > { %s347_s19 = sadd.s32 4294967295, %s373_s18   ;;  %p351_p0 = scmp.ge.s32.totalorder %s373_s18, 1  ;;  %s373_s18 = sphi %s405_s18, %s15_s18  }
   0x2   : > { %p186_p1 = scmp.lt.s32.totalorder %s373_s18, 3 }
   0x4   : > { %p187_p2 = pnand %p351_p0, %p186_p1 }
   0x5   : > { %p212_p3 = scmp.lt.s32.totalorder (!%p187_p2), %s347_s19, 1 }
   0x6   : > { %190 = sbr.rel (%p187_p2) target bundleno = 274 (0x112), region = 40 }
   0xb   : > { %v222_v0 = vld [vmem:[%s490_s1 + $0x8] sm:$0xff]  ;;  %v221_v1 = vld [vmem:[%s490_s1] sm:$0xff]  ;;  %v267_v2 = vld [vmem:[%s492_s3 + $0x78] sm:$0xff]  ;;  %s496_s19 = smov (!%p212_p3, %s347_s19), 1  ;;  %vm227_vm0 = vcmask 130048   ;;  %vm292_vm1 = vcmask 64512  }
   0xc   : > { %245 = vmatpush.msra.mxu0 %v222_v0  ;;  %272 = vmatpush.msra.mxu1 %v267_v2  ;;  %v266_v3 = vld [vmem:[%s492_s3 + $0x70] sm:$0xff]  ;;  %v265_v4 = vld [vmem:[%s492_s3 + $0x68] sm:$0xff]  ;;  %s352_s30 = sshll.u32 %s496_s19, 3  ;;  %v264_v5 = vld [vmem:[%s492_s3 + $0x60] sm:$0xff] }
   0xd   : > { %s215_s10 = scalar_lea.vmem %s489_s0, %s352_s30  ;;  %v263_v7 = vld [vmem:[%s492_s3 + $0x58] sm:$0xff]  ;;  %v262_v8 = vld [vmem:[%s492_s3 + $0x50] sm:$0xff]  ;;  %v261_v9 = vld [vmem:[%s492_s3 + $0x48] sm:$0xff]  ;;  %s219_s21 = scalar_lea.vmem %s494_s5, %s352_s30 }
   0xe   : > { %246 = vmatpush.msra.mxu0 %v221_v1  ;;  %273 = vmatpush.msra.mxu1 %v266_v3  ;;  %v220_v6 = vld [vmem:[%s215_s10] sm:$0xff]  ;;  %v259_v11 = vld [vmem:[%s492_s3 + $0x38] sm:$0xff]  ;;  %v258_v12 = vld [vmem:[%s492_s3 + $0x30] sm:$0xff] }
   0xf   : > { %354 = vmatmul.msk.f32.vlgmr.msra.gmra.mxu0 %vm227_vm0, %v220_v6  ;;  %v260_v10 = vld [vmem:[%s492_s3 + $0x40] sm:$0xff]  ;;  %v257_v13 = vld [vmem:[%s492_s3 + $0x28] sm:$0xff]  ;;  %v255_v15 = vld [vmem:[%s492_s3 + $0x18] sm:$0xff] }
  0x10   : > { %274 = vmatpush.msra.mxu1 %v265_v4  ;;  %v256_v14 = vld [vmem:[%s492_s3 + $0x20] sm:$0xff]  ;;  %v254_v16 = vld [vmem:[%s492_s3 + $0x10] sm:$0xff]  ;;  %v253_v17 = vld [vmem:[%s492_s3 + $0x8] sm:$0xff] }
  0x11   : > { %v252_v18 = vld [vmem:[%s492_s3] sm:$0xff] }
  0x12   : > { %275 = vmatpush.msra.mxu1 %v264_v5  ;;  %v365_v19 = vld [vmem:[%s491_s2] ss:$0 sm:$0xff] }
  0x13   : > { %v366_v23 = vld [vmem:[%s493_s4] ss:$0 sm:$0xff] }
  0x14   : > { %276 = vmatpush.msra.mxu1 %v263_v7 }
  0x16   : > { %277 = vmatpush.msra.mxu1 %v262_v8 }
  0x18   : > { %278 = vmatpush.msra.mxu1 %v261_v9 }
  0x1a   : > { %279 = vmatpush.msra.mxu1 %v260_v10 }
  0x1c   : > { %280 = vmatpush.msra.mxu1 %v259_v11 }
  0x1e   : > { %281 = vmatpush.msra.mxu1 %v258_v12 }
  0x20   : > { %282 = vmatpush.msra.mxu1 %v257_v13 }
  0x22   : > { %283 = vmatpush.msra.mxu1 %v256_v14 }
  0x24   : > { %284 = vmatpush.msra.mxu1 %v255_v15 }
  0x26   : > { %285 = vmatpush.msra.mxu1 %v254_v16 }
  0x28   : > { %286 = vmatpush.msra.mxu1 %v253_v17 }
  0x2a   : > { %287 = vmatpush.msra.mxu1 %v252_v18 }
  0x8c   : > { %v248_v20 = vpop.f32.mrf.mxu0 }
  0x8d   : > { %v249_v21 = vadd.f32 %v365_v19, %v248_v20 }
  0x8f   : > { %v251_v22 = vmax.f32 %v249_v21, 0.0 }
  0x91   : > { %288 = vmatmul.f32.vlgmr.msra.gmra.mxu1 %v251_v22 }
 0x10e   : > { %v289_v24 = vpop.f32.mrf.mxu1 }
 0x10f   : > { %v290_v25 = vadd.f32 %v366_v23, %v289_v24 }
 0x111   : > { %293 = vst.msk [vmem:[%s219_s21] sm:$0xff] %vm292_vm1, %v290_v25 }
 0x112 PF: > { %s15_s18 = sadd.s32 1, %s373_s18  }
 0x113   : > { %p12_p4 = scmp.ge.s32.totalorder %s15_s18, 4  }
 0x115   :  { %14 = sbr.rel (!%p12_p4) target bundleno = 1 (0x1), region = 70 }

</bundles_post_ra>
